<compile_context>
chip_gen: v7x
topology: tpu7x:2x2x1
jax: 0.10.0
libtpu: 0.0.40
codegen_flags: <defaults>
</compile_context>

<pallas_src>
import functools

import jax
import jax.numpy as jnp
from jax import lax
from jax.experimental import pallas as pl
from jax.experimental.pallas import tpu as pltpu


def _round_up(a, b):
    return ((a + b - 1) // b) * b


def _fused_conv_kernel(w_ref, b_ref, x_ref, o_ref, *, offs, toc):
    """One grid step = one row-chunk of one image.

    w_ref : (4, CO_PAD, 4*C)  phase-folded fused weights (one matrix per column offset)
    b_ref : (CO_PAD, 1)       fused bias (conv biases + the -4.2e-5 constant)
    x_ref : (1, 1, 4*C, LH)   phase-split input chunk, flattened (row*OWp + col), + halo
    o_ref : (1, CO_PAD, TOC)  lane-dense output chunk
    """
    acc = jnp.dot(w_ref[0], x_ref[0, 0, :, pl.ds(offs[0], toc)],
                  preferred_element_type=jnp.float32)
    for g in (1, 2, 3):
        acc = acc + jnp.dot(w_ref[g], x_ref[0, 0, :, pl.ds(offs[g], toc)],
                            preferred_element_type=jnp.float32)
    o_ref[0] = acc + b_ref[...]


def model_forward(x, w3, b3, w1, b1):
    """x: (N, 3, H, W) NCHW.  Returns (N, 6, OH, OW) NCHW, like the PyTorch module."""
    N, C, H, W = x.shape
    x = x.astype(jnp.float32)
    Cmid = w3.shape[0]
    Cout = w1.shape[0]
    CO_PAD = _round_up(Cout, 8)          # pad channels to a full sublane group
    QC = 4 * C                           # phase-split channels

    OH = (H - 1) // 2 + 1                # conv k=3, s=2, p=1
    OW = (W - 1) // 2 + 1
    OWp = OW + 1                         # phase-array width (includes the +1 halo column)

    # ---- fold conv3 -> conv1 -> (-4.2e-5) into one linear map -------------------------
    w3m = w3.reshape(Cmid, C * 9).astype(jnp.float32)     # k = c*9 + kh*3 + kw (OIHW)
    w1m = w1.reshape(Cout, Cmid).astype(jnp.float32)
    w_fused = w1m @ w3m                                   # (Cout, C*9)
    b_fused = (w1m @ b3.astype(jnp.float32) + b1.astype(jnp.float32)
               - jnp.float32(4.2e-05))                    # (Cout,)

    # ---- grid layout: one row-chunk of one image per step (>=2 steps when N==1) -------
    RSPLIT = 2 if (N == 1 and OH >= 2) else 1
    RC = -(-OH // RSPLIT)                # output rows per chunk
    OH_PAD = RC * RSPLIT

    TOC = _round_up(RC * OWp, 128)       # output lanes per grid step (lane-dense)
    LH = _round_up(TOC + OWp + 2, 128)   # input lanes per grid step (covers the halo)

    # ---- 2x2 phase split (space-to-depth) of the zero-padded input --------------------
    HPAD = 2 * (OH_PAD + 1)
    WPAD = 2 * OWp
    xpad = jnp.pad(x, ((0, 0), (0, 0), (1, HPAD - 1 - H), (1, WPAD - 1 - W)))
    ph = xpad.reshape(N, C, OH_PAD + 1, 2, OWp, 2)
    ph = jnp.transpose(ph, (0, 1, 3, 5, 2, 4))            # (N, C, pr, pc, r, s)
    ph = ph.reshape(N, QC, OH_PAD + 1, OWp)               # q = c*4 + pr*2 + pc

    # row chunks (one duplicated halo row each), flattened per chunk to LH lanes
    chunks = [ph[:, :, k * RC:k * RC + RC + 1, :] for k in range(RSPLIT)]
    xs = jnp.stack(chunks, axis=1)                        # (N, RSPLIT, QC, RC+1, OWp)
    xs = xs.reshape(N, RSPLIT, QC, (RC + 1) * OWp)
    xs = jnp.pad(xs, ((0, 0), (0, 0), (0, 0), (0, LH - (RC + 1) * OWp)))

    # ---- phase-folded weights: one (CO_PAD, QC) matrix per column offset --------------
    W4 = jnp.zeros((4, CO_PAD, QC), jnp.float32)
    for a in (0, 1):
        for b in (0, 1):
            g = a * 2 + b
            for pr in (0, 1):
                dr = 2 * a + pr
                if dr > 2:
                    continue
                for pc in (0, 1):
                    dc = 2 * b + pc
                    if dc > 2:
                        continue
                    for c in range(C):
                        W4 = W4.at[g, :Cout, c * 4 + pr * 2 + pc].set(
                            w_fused[:, c * 9 + dr * 3 + dc])
    bpad = jnp.zeros((CO_PAD, 1), jnp.float32).at[:Cout, 0].set(b_fused)

    offs = (0, 1, OWp, OWp + 1)          # column offsets for the 4 phase groups
    kernel = functools.partial(_fused_conv_kernel, offs=offs, toc=TOC)

    cost = pl.CostEstimate(
        flops=2 * N * RSPLIT * TOC * QC * CO_PAD * 4,
        transcendentals=0,
        bytes_accessed=4 * (N * RSPLIT * (QC * LH + CO_PAD * TOC)
                            + 4 * CO_PAD * QC + CO_PAD),
    )

    out = pl.pallas_call(
        kernel,
        out_shape=jax.ShapeDtypeStruct((N, CO_PAD, RSPLIT * TOC), jnp.float32),
        grid=(N, RSPLIT),
        in_specs=[
            pl.BlockSpec((4, CO_PAD, QC), lambda n, k: (0, 0, 0)),   # weights, VMEM-resident
            pl.BlockSpec((CO_PAD, 1), lambda n, k: (0, 0)),          # bias, VMEM-resident
            pl.BlockSpec((1, 1, QC, LH), lambda n, k: (n, k, 0, 0)), # phase-split chunk
        ],
        out_specs=pl.BlockSpec((1, CO_PAD, TOC), lambda n, k: (n, 0, k)),
        compiler_params=pltpu.CompilerParams(
            dimension_semantics=("parallel", "parallel")),
        cost_estimate=cost,
    )(W4, bpad, xs)

    # drop padded rows / cols / channels; NCHW comes out directly (slice only, no transpose)
    # TODO(synk): this slice is one extra output-sized copy; it could be removed by sizing
    # TOC/OWp exactly, at the cost of strided (non-lane-dense) stores in the kernel.
    y = out.reshape(N, CO_PAD, RSPLIT, TOC)[:, :, :, :RC * OWp]
    y = y.reshape(N, CO_PAD, OH_PAD, OWp)
    return y[:, :Cout, :OH, :OW]


def _reference(x, w3, b3, w1, b1):
    dn = ("NCHW", "OIHW", "NCHW")
    y = lax.conv_general_dilated(x, w3, (2, 2), ((1, 1), (1, 1)), dimension_numbers=dn)
    y = y + b3[None, :, None, None]
    y = lax.conv_general_dilated(y, w1, (1, 1), "VALID", dimension_numbers=dn)
    y = y + b1[None, :, None, None]
    return y - 4.2e-05


if __name__ == "__main__":
    key = jax.random.PRNGKey(0)
    kx, k1, k2, k3, k4 = jax.random.split(key, 5)

    C = 3
    # deterministic PyTorch-style uniform init (kaiming-uniform-ish bounds)
    fan3 = C * 3 * 3
    bound3 = 1.0 / (fan3 ** 0.5)
    w3 = jax.random.uniform(k1, (6, C, 3, 3), jnp.float32, -bound3, bound3)
    b3 = jax.random.uniform(k2, (6,), jnp.float32, -bound3, bound3)

    fan1 = 6 * 1 * 1
    bound1 = 1.0 / (fan1 ** 0.5)
    w1 = jax.random.uniform(k3, (6, 6, 1, 1), jnp.float32, -bound1, bound1)
    b1 = jax.random.uniform(k4, (6,), jnp.float32, -bound1, bound1)

    # N=2 exercises the one-chunk-per-image path; N=1 exercises the 2-chunk (v7x) split.
    for shape in ((2, C, 16, 16), (1, C, 16, 16)):
        x = jax.random.normal(kx, shape, dtype=jnp.float32)
        out = jax.block_until_ready(model_forward(x, w3, b3, w1, b1))
        ref = jax.block_until_ready(_reference(x, w3, b3, w1, b1))
        assert out.shape == ref.shape == (shape[0], 6, 8, 8), (out.shape, ref.shape)
        assert bool(jnp.allclose(out, ref, atol=1e-5, rtol=1e-5)), "mismatch vs reference conv"

    print("KERNEL_OK")
</pallas_src>

<mosaic_0001>
module attributes {stable_mosaic.version = 11 : i64} {
  func.func @_fused_conv_kernel(%arg0: i32, %arg1: i32, %arg2: memref<4x8x12xf32, #tpu.memory_space<vmem>>, %arg3: memref<8x1xf32, #tpu.memory_space<vmem>>, %arg4: memref<1x1x12x256xf32, #tpu.memory_space<vmem>>, %arg5: memref<1x8x128xf32, #tpu.memory_space<vmem>>) attributes {dimension_semantics = [#tpu.dimension_semantics<parallel>, #tpu.dimension_semantics<parallel>], iteration_bounds = array<i64: 2, 1>, scalar_prefetch = 0 : i64, scratch_operands = 0 : i64, tpu.core_type = #tpu.core_type<tc>, window_params = [{pipeline_mode = #tpu.pipeline_mode<synchronous>, transform_indices = @transform_0, window_bounds = array<i64: 4, 8, 12>}, {pipeline_mode = #tpu.pipeline_mode<synchronous>, transform_indices = @transform_1, window_bounds = array<i64: 8, 1>}, {transform_indices = @transform_2, window_bounds = array<i64: 1, 1, 12, 256>}, {transform_indices = @transform_3, window_bounds = array<i64: 1, 8, 128>}]} {
    %c0 = arith.constant 0 : index
    %c0_0 = arith.constant 0 : index
    %c0_1 = arith.constant 0 : index
    %0 = vector.load %arg2[%c0, %c0_0, %c0_1] : memref<4x8x12xf32, #tpu.memory_space<vmem>>, vector<1x8x12xf32>
    %1 = vector.shape_cast %0 : vector<1x8x12xf32> to vector<8x12xf32>
    %c0_2 = arith.constant 0 : index
    %c0_3 = arith.constant 0 : index
    %c0_4 = arith.constant 0 : index
    %c0_5 = arith.constant 0 : index
    %2 = vector.load %arg4[%c0_2, %c0_3, %c0_4, %c0_5] : memref<1x1x12x256xf32, #tpu.memory_space<vmem>>, vector<1x1x12x128xf32>
    %3 = vector.shape_cast %2 : vector<1x1x12x128xf32> to vector<12x128xf32>
    %cst = arith.constant dense<0.000000e+00> : vector<8x128xf32>
    %4 = tpu.matmul %1, %3, %cst {dimension_numbers = #tpu.dot_dimension_numbers<[1], [0], [0], [1], [0, 0, 1, 1], [], []>} : vector<8x12xf32>, vector<12x128xf32>, vector<8x128xf32> -> vector<8x128xf32>
    %c1 = arith.constant 1 : index
    %c0_6 = arith.constant 0 : index
    %c0_7 = arith.constant 0 : index
    %5 = vector.load %arg2[%c1, %c0_6, %c0_7] : memref<4x8x12xf32, #tpu.memory_space<vmem>>, vector<1x8x12xf32>
    %6 = vector.shape_cast %5 : vector<1x8x12xf32> to vector<8x12xf32>
    %c0_8 = arith.constant 0 : index
    %c0_9 = arith.constant 0 : index
    %c0_10 = arith.constant 0 : index
    %c1_11 = arith.constant 1 : index
    %7 = vector.load %arg4[%c0_8, %c0_9, %c0_10, %c1_11] : memref<1x1x12x256xf32, #tpu.memory_space<vmem>>, vector<1x1x12x128xf32>
    %8 = vector.shape_cast %7 : vector<1x1x12x128xf32> to vector<12x128xf32>
    %cst_12 = arith.constant dense<0.000000e+00> : vector<8x128xf32>
    %9 = tpu.matmul %6, %8, %cst_12 {dimension_numbers = #tpu.dot_dimension_numbers<[1], [0], [0], [1], [0, 0, 1, 1], [], []>} : vector<8x12xf32>, vector<12x128xf32>, vector<8x128xf32> -> vector<8x128xf32>
    %10 = arith.addf %4, %9 : vector<8x128xf32>
    %c2 = arith.constant 2 : index
    %c0_13 = arith.constant 0 : index
    %c0_14 = arith.constant 0 : index
    %11 = vector.load %arg2[%c2, %c0_13, %c0_14] : memref<4x8x12xf32, #tpu.memory_space<vmem>>, vector<1x8x12xf32>
    %12 = vector.shape_cast %11 : vector<1x8x12xf32> to vector<8x12xf32>
    %c0_15 = arith.constant 0 : index
    %c0_16 = arith.constant 0 : index
    %c0_17 = arith.constant 0 : index
    %c9 = arith.constant 9 : index
    %13 = vector.load %arg4[%c0_15, %c0_16, %c0_17, %c9] : memref<1x1x12x256xf32, #tpu.memory_space<vmem>>, vector<1x1x12x128xf32>
    %14 = vector.shape_cast %13 : vector<1x1x12x128xf32> to vector<12x128xf32>
    %cst_18 = arith.constant dense<0.000000e+00> : vector<8x128xf32>
    %15 = tpu.matmul %12, %14, %cst_18 {dimension_numbers = #tpu.dot_dimension_numbers<[1], [0], [0], [1], [0, 0, 1, 1], [], []>} : vector<8x12xf32>, vector<12x128xf32>, vector<8x128xf32> -> vector<8x128xf32>
    %16 = arith.addf %10, %15 : vector<8x128xf32>
    %c3 = arith.constant 3 : index
    %c0_19 = arith.constant 0 : index
    %c0_20 = arith.constant 0 : index
    %17 = vector.load %arg2[%c3, %c0_19, %c0_20] : memref<4x8x12xf32, #tpu.memory_space<vmem>>, vector<1x8x12xf32>
    %18 = vector.shape_cast %17 : vector<1x8x12xf32> to vector<8x12xf32>
    %c0_21 = arith.constant 0 : index
    %c0_22 = arith.constant 0 : index
    %c0_23 = arith.constant 0 : index
    %c10 = arith.constant 10 : index
    %19 = vector.load %arg4[%c0_21, %c0_22, %c0_23, %c10] : memref<1x1x12x256xf32, #tpu.memory_space<vmem>>, vector<1x1x12x128xf32>
    %20 = vector.shape_cast %19 : vector<1x1x12x128xf32> to vector<12x128xf32>
    %cst_24 = arith.constant dense<0.000000e+00> : vector<8x128xf32>
    %21 = tpu.matmul %18, %20, %cst_24 {dimension_numbers = #tpu.dot_dimension_numbers<[1], [0], [0], [1], [0, 0, 1, 1], [], []>} : vector<8x12xf32>, vector<12x128xf32>, vector<8x128xf32> -> vector<8x128xf32>
    %22 = arith.addf %16, %21 : vector<8x128xf32>
    %c0_25 = arith.constant 0 : index
    %c0_26 = arith.constant 0 : index
    %23 = vector.load %arg3[%c0_25, %c0_26] : memref<8x1xf32, #tpu.memory_space<vmem>>, vector<8x1xf32>
    %24 = vector.broadcast %23 : vector<8x1xf32> to vector<8x128xf32>
    %25 = arith.addf %22, %24 : vector<8x128xf32>
    %c0_27 = arith.constant 0 : index
    %c0_28 = arith.constant 0 : index
    %c0_29 = arith.constant 0 : index
    %26 = vector.load %arg5[%c0_27, %c0_28, %c0_29] : memref<1x8x128xf32, #tpu.memory_space<vmem>>, vector<1x8x128xf32>
    %27 = vector.shape_cast %26 : vector<1x8x128xf32> to vector<8x128xf32>
    %28 = vector.shape_cast %25 : vector<8x128xf32> to vector<1x8x128xf32>
    tpu.vector_store %arg5[%c0_27, %c0_28, %c0_29], %28 {strides = array<i32>} : memref<1x8x128xf32, #tpu.memory_space<vmem>>, vector<1x8x128xf32>,
    return
  }
  func.func @transform_0(%arg0: i32, %arg1: i32) -> (i32, i32, i32) {
    %c0_i32 = arith.constant 0 : i32
    %c0_i32_0 = arith.constant 0 : i32
    %c0_i32_1 = arith.constant 0 : i32
    %c0_i32_2 = arith.constant 0 : i32
    return %c0_i32, %c0_i32_0, %c0_i32_1 : i32, i32, i32
  }
  func.func @transform_1(%arg0: i32, %arg1: i32) -> (i32, i32) {
    %c0_i32 = arith.constant 0 : i32
    %c0_i32_0 = arith.constant 0 : i32
    %c0_i32_1 = arith.constant 0 : i32
    return %c0_i32, %c0_i32_0 : i32, i32
  }
  func.func @transform_2(%arg0: i32, %arg1: i32) -> (i32, i32, i32, i32) {
    %c0_i32 = arith.constant 0 : i32
    %c0_i32_0 = arith.constant 0 : i32
    %c0_i32_1 = arith.constant 0 : i32
    return %arg0, %arg1, %c0_i32, %c0_i32_0 : i32, i32, i32, i32
  }
  func.func @transform_3(%arg0: i32, %arg1: i32) -> (i32, i32, i32) {
    %c0_i32 = arith.constant 0 : i32
    %c0_i32_0 = arith.constant 0 : i32
    return %arg0, %c0_i32, %arg1 : i32, i32, i32
  }
}

</mosaic_0001>

<bundles_post_ra>
// kernel: tpu_custom_call.1
= control target key start
LH: loop header
LB: loop body
LE: loop exit
PB: predicated region body
PF: predicated region fallthrough
CT: control target
= control target key end

     0   :  { %8 = vsyncpa [#allocation3], 0  ;;  %s1088_s0 = inlined_call_operand.vmem [shape: f32[4,8,12], index: 0, kind: input, shape index: {}]   ;;  %s1089_s1 = inlined_call_operand.vmem [shape: f32[8,1], index: 1, kind: input, shape index: {}]   ;;  %s1090_s2 = inlined_call_operand.vmem [shape: f32[2,1,12,256], index: 2, kind: input, shape index: {}]   ;;  %s1091_s3 = inlined_call_operand.hbm [shape: f32[2,8,128], index: 3, kind: output, shape index: {}]  }
   0x1   :  { %10 = vsyncpa [#allocation3 + $0x1], 0  ;;  %s935_s12 = smov 0   ;;  %s937_s13 = smov 0  }
   0x2   :  { %s939_s14 = smov 0   ;;  %s941_s15 = smov 0  }
   0x3   :  { %s943_s16 = smov 0   ;;  %s945_s17 = smov 0  }
   0x4 LB: > { %s652_s18 = sadd.s32 4294967295, %s904_s17   ;;  %s653_s19 = sadd.s32 4294967294, %s904_s17   ;;  %s904_s17 = sphi %s945_s17, %s16_s17   ;;  %s900_s16 = sphi %s943_s16, %s1100_s16   ;;  %s896_s15 = sphi %s941_s15, %s1099_s15   ;;  %s892_s14 = sphi %s939_s14, %s1098_s14   ;;  %s888_s13 = sphi %s937_s13, %s1097_s13   ;;  %s884_s12 = sphi %s935_s12, %s1096_s12  }
   0x5   : > { %s28_s20 = sadd.s32 1, %s900_s16  ;;  %s107_s21 = sadd.s32 1, %s892_s14 }
   0x6   : > { %p30_p0 = scmp.ge.s32.totalorder %s28_s20, 2  ;;  %p117_p1 = scmp.ne.s32.totalorder %s892_s14, %s888_s13 }
   0x7   : > { %p118_p2 = scmp.eq.s32.totalorder %s652_s18, 1  ;;  %p123_p3 = scmp.ne.s32.totalorder %s888_s13, %s884_s12 }
   0x8   : > { %s1102_s20 = smov (%p30_p0, %s28_s20), 0  ;;  %p124_p5 = scmp.eq.s32.totalorder %s653_s19, 1 }
   0x9   : > { %p975_p4 = por %p118_p2, %p117_p1  ;;  %s102_s23 = ssub.s32 %s900_s16, %s1102_s20 }
   0xa   : > { %p656_p6 = scmp.ge.s32.totalorder %s904_s17, 1  ;;  %p105_p7 = scmp.eq.s32.totalorder %s102_s23, 0 }
   0xb   : > { %p982_p8 = por %p124_p5, %p123_p3  ;;  %p160_p9 = scmp.lt.s32.totalorder %s904_s17, 3 }
   0xc   : > { %s988_s25 = scalar_select %p105_p7, %s892_s14, %s107_s21  }
   0xd   : > { %p161_p10 = pnand %p656_p6, %p160_p9 }
   0xe   : > { %p188_p11 = scmp.lt.s32.totalorder (!%p161_p10), %s896_s15, 1  ;;  %v906_v0 = vmov (!%p161_p10), 0.0|0.0   ;;  %vm224_vm0 = vcmask (!%p161_p10), 1043456   ;;  %vm907_vm1 = vmmov (!%p161_p10), 1   ;;  %vm908_vm3 = vmmov (!%p161_p10), 0   ;;  %s910_s4 = smov (!%p161_p10), 119  }
   0xf   : > { %164 = sbr.rel (%p161_p10) target bundleno = 392 (0x188), region = 32  ;;  %716 = vmatprep.subr.bf16.mxu0 (!%p161_p10), %v906_v0  ;;  %720 = vmatprep.subr.bf16.mxu1 (!%p161_p10), %v906_v0  ;;  %vm997_vm2 = vmpackc.low (!%p161_p10), %vm224_vm0, %vm907_vm1  ;;  %v909_v8 = vmov (!%p161_p10), 0.0   ;;  %s911_s5 = smov (!%p161_p10), 127   ;;  %vm220_vm4 = vcmask (!%p161_p10), 97280   ;;  %v197_v10 = vld [vmem:[%s1088_s0] sm:$0xff] (!%p161_p10)  ;;  %v912_v11 = vmov (!%p161_p10), 0  }
  0x10   : > { %692 = vmatprep.mubr.msk.f32.mxu0 (!%p161_p10), %vm908_vm3, %v909_v8  ;;  %699 = vmatprep.mubr.msk.f32.mxu1 (!%p161_p10), %vm908_vm3, %v909_v8  ;;  %s913_s8 = smov (!%p161_p10), 118   ;;  %v552_v12 = vld [vmem:[%s1089_s1] sm:$0xff] (!%p161_p10)  ;;  %vm216_vm5 = vcmask (!%p161_p10), 1039360   ;;  %vm382_vm6 = vcmask (!%p161_p10), 973824   ;;  %vm472_vm7 = vcmask (!%p161_p10), 965632   ;;  %v660_v35 = vld [vmem:[%s1088_s0 + $0x8] sm:$0xff] (!%p161_p10) }
  0x11   : > { %825 = vset.pattern.permute.xlu0 (!%p161_p10), %v912_v11  ;;  %v665_v41 = vld [vmem:[%s1088_s0 + $0x10] sm:$0xff] (!%p161_p10)  ;;  %v668_v42 = vld [vmem:[%s1088_s0 + $0x18] sm:$0xff] (!%p161_p10)  ;;  %s672_s29 = sshll.u32 (!%p161_p10), %s896_s15, 7 }
  0x12   : > { %s1041_s7 = scalar_lea.hbm (!%p161_p10), %s1091_s3, %s672_s29 }
  0x16   : > { %s189_s26 = scalar_select %p188_p11, %s896_s15, 1 }
  0x17   : > { %s914_s15 = smov [#allocation2]  }
  0x18   : > { %s675_s27 = sshll.u32 %s189_s26, 5  ;;  %s830_s10 = sshll.u32 %s914_s15, 4  ;;  %s831_s10 = int_to_ptr.vmem [resolvable:$false] %s830_s10 }
  0x19   : > { %s196_s30 = scalar_lea.vmem %s1090_s2, %s675_s27  ;;  %s185_s27 = sand.u32 1, %s888_s13  }
  0x1a   : > { %v198_v1 = vld [vmem:[%s196_s30] sm:$0xff]  ;;  %v202_v2 = vld [vmem:[%s196_s30 + $0x8] sm:$0xff]  ;;  %v199_v3 = vld [vmem:[%s196_s30 + $0x10] sm:$0xf]  ;;  %s657_s28 = sshll.u32 %s185_s27, 3  ;;  %s832_s11 = scalar_lea.vmem %s831_s10, 256 }
  0x1b   : > { %v805_v4 = vpack.i.bf16 %v202_v2, %v198_v1  ;;  %v203_v5 = vld [vmem:[%s196_s30 + $0x18] sm:$0xf]  ;;  %v721_v7 = vpack.c.bf16 %v199_v3, %v198_v1  ;;  %s187_s30 = scalar_lea.vmem [#allocation2], %s657_s28 }
  0x1c   : > { %v810_v9 = vpack.i.bf16 %v203_v5, %v199_v3 }
  0x1d   : > { %806 = vrot.lane.b32.xlu1 %v805_v4, %s910_s4  ;;  %796 = vrot.lane.b32.xlu0 %v805_v4, %s911_s5 }
  0x1e   : > { %723 = vmatpush3.bf16.msk.msra.mxu1 %vm997_vm2, %v721_v7 }
  0x1f   : > { %728 = vmatprep.subr.bf16.mxu1 %v906_v0 }
  0x21   : > { %811 = vrot.lane.b32.xlu1 %v810_v9, %s910_s4  ;;  %801 = vrot.lane.b32.xlu0 %v810_v9, %s911_s5  ;;  %s575_s4 = sshll.u32 %s187_s30, 4  ;;  %s1043_s4 = int_to_ptr.vmem [resolvable:$true] %s575_s4 }
  0x22   : > { %700 = vmatmul.mubr.msk.f32.vlgmr.msra.gmra.mrb[0].mxu1 %vm220_vm4, %v197_v10  ;;  %s826_s9 = scalar_lea.vmem %s1043_s4, 128  ;;  %p833_p1 = scmp.lt.s32.totalorder %s1043_s4, %s831_s10 }
  0x23   : > { %713 = vmatprep.mubr.msk.f32.mxu1 %vm908_vm3, %v909_v8  ;;  %p827_p12 = scmp.ne.s32.totalorder %s1043_s4, %s826_s9  ;;  %p834_p2 = scmp.lt.s32.totalorder %s832_s11, %s826_s9 }
  0x25   : > { %821 = vrot.lane.b32.xlu1 %v810_v9, %s913_s8  ;;  %816 = vrot.lane.b32.xlu0 %v805_v4, %s913_s8  ;;  %s561_s8 = scalar_lea.sflag [#allocation3], %s185_s27  ;;  %p828_p13 = pnand %p827_p12, %p975_p4 }
  0x26   : > { %p835_p3 = por %p834_p2, %p833_p1 }
  0x27   : > { %p829_p0 = pneg %p828_p13 }
  0x29   : > { %555 = vperm.xlu0 %825, %v552_v12   ;;  %p836_p5 = pnand %p835_p3, %p829_p0 }
  0x8f   : > { %v807_v13 = vpop.permute.xlu1 %806  ;;  %v797_v14 = vpop.permute.xlu0 %796 }
  0x90   : > { %v799_v15 = vunpack.i.h.bf16 %v797_v14  ;;  %v798_v16 = vunpack.i.l.bf16 %v797_v14  ;;  %v809_v23 = vunpack.i.h.bf16 %v807_v13  ;;  %v808_v24 = vunpack.i.l.bf16 %v807_v13 }
  0x92   : > { %v217_v25 = vsel %vm216_vm5, %v798_v16, %v799_v15  ;;  %v383_v36 = vsel %vm382_vm6, %v808_v24, %v809_v23 }
  0x93   : > { %v812_v17 = vpop.permute.xlu1 %811  ;;  %v802_v18 = vpop.permute.xlu0 %801 }
  0x94   : > { %v814_v19 = vunpack.i.h.bf16 %v812_v17  ;;  %v813_v20 = vunpack.i.l.bf16 %v812_v17  ;;  %v804_v21 = vunpack.i.h.bf16 %v802_v18  ;;  %v803_v22 = vunpack.i.l.bf16 %v802_v18 }
  0x96   : > { %v218_v26 = vsel %vm216_vm5, %v803_v22, %v804_v21  ;;  %v384_v27 = vsel %vm382_vm6, %v813_v20, %v814_v19 }
  0x97   : > { %v822_v28 = vpop.permute.xlu1 %821  ;;  %v817_v29 = vpop.permute.xlu0 %816  ;;  %v717_v30 = vpack.c.bf16 %v218_v26, %v217_v25  ;;  %v725_v39 = vpack.c.bf16 %v384_v27, %v383_v36 }
  0x98   : > { %v824_v31 = vunpack.i.h.bf16 %v822_v28  ;;  %v823_v32 = vunpack.i.l.bf16 %v822_v28  ;;  %v819_v33 = vunpack.i.h.bf16 %v817_v29  ;;  %v818_v34 = vunpack.i.l.bf16 %v817_v29 }
  0x99   : > { %719 = vmatpush3.bf16.msk.msra.mxu0 %vm997_vm2, %v717_v30 }
  0x9a   : > { %v474_v37 = vsel %vm472_vm7, %v823_v32, %v824_v31  ;;  %v473_v38 = vsel %vm472_vm7, %v818_v34, %v819_v33  ;;  %724 = vmatprep.subr.bf16.mxu0 %v906_v0 }
  0x9b   : > { %v729_v40 = vpack.c.bf16 %v474_v37, %v473_v38 }
  0x9c   : > { %693 = vmatmul.mubr.msk.f32.vlgmr.msra.gmra.mrb[0].mxu0 %vm220_vm4, %v660_v35 }
  0x9d   : > { %727 = vmatpush3.bf16.msk.msra.mxu0 %vm997_vm2, %v725_v39  ;;  %706 = vmatprep.mubr.msk.f32.mxu0 %vm908_vm3, %v909_v8 }
  0x9e   : > { %731 = vmatpush3.bf16.msk.msra.mxu1 %vm997_vm2, %v729_v40 }
  0xa0   : > { %707 = vmatmul.mubr.msk.f32.vlgmr.msra.gmra.mrb[2].mxu0 %vm220_vm4, %v665_v41 }
  0xa1   : > { %714 = vmatmul.mubr.msk.f32.vlgmr.msra.gmra.mrb[2].mxu1 %vm220_vm4, %v668_v42 }
  0xa8   : > { %v556_v53 = vpop.permute.xlu0 %555 }
  0xf5   : > { %v368_v43 = vpop.f32.mrb[0].mxu1 }
  0xf6   : > { %v701_v44 = vpop.f32.mrb[1].mxu1 }
 0x16f   : > { %v293_v45 = vpop.f32.mrb[0].mxu0 }
 0x170   : > { %v694_v46 = vpop.f32.mrb[1].mxu0  ;;  %v369_v47 = vadd.f32 %v368_v43, %v293_v45 }
 0x173   : > { %v457_v48 = vpop.f32.mrb[2].mxu0 }
 0x174   : > { %v461_v49 = vadd.f32 %v457_v48, %v369_v47  ;;  %v708_v50 = vpop.f32.mrb[3].mxu0  ;;  %v547_v51 = vpop.f32.mrb[2].mxu1 }
 0x175   : > { %v715_v52 = vpop.f32.mrb[3].mxu1 }
 0x176   : > { %v551_v54 = vadd.f32 %v547_v51, %v461_v49 }
 0x178   : > { %v558_v55 = vadd.f32 %v556_v53, %v551_v54 }
 0x17a   : > { %559 = vst [vmem:[%s187_s30] sm:$0xff] %v558_v55 }
 0x17b   : > { %839 = shalt.err (!%p836_p5)
}
 0x17c   : > { %s840_s18 = scalar_lea.hbm %s1041_s7, 128  ;;  %s844_s23 = scalar_lea.hbm %s1091_s3, 256 }
 0x17d   : > { %p841_p6 = scmp.ne.s32.totalorder %s1041_s7, %s840_s18  ;;  %p845_p10 = scmp.lt.u32.totalorder %s1041_s7, %s1091_s3 }
 0x17e   : > { %p846_p11 = scmp.lt.u32.totalorder %s844_s23, %s840_s18  ;;  %p848_p13 = scmp.lt.u32.totalorder %s840_s18, %s1041_s7 }
 0x17f   : > { %p842_p7 = pnand %p841_p6, %p975_p4 }
 0x180   : > { %p847_p12 = por %p846_p11, %p845_p10 }
 0x181   : > { %p843_p9 = pneg %p842_p7 }
 0x182   : > { %p849_p0 = por %p848_p13, %p847_p12 }
 0x184   : > { %p850_p1 = pnand %p849_p0, %p843_p9 }
 0x186   : > { %853 = shalt.err (!%p850_p1)
}
 0x187   : > { %732 = dma.vmem_to_hbm [thread:$0]  (%p975_p4), %s1043_s4, 128, %s1041_s7, %s561_s8  }
 0x188 PF: > { %p738_p2 = scmp.ge.s32.totalorder %s904_s17, 2  ;;  %s587_s28 = sand.u32 1, %s884_s12  }
 0x189   : > { %s588_s29 = scalar_lea.sflag [#allocation3], %s587_s28 }
 0x18a   : > { %p735_p3 = pnand %p738_p2, %p982_p8 }
 0x18c   : > { %879 = dma.done.wait (!%p735_p3), %s588_s29, 128  }
 0x18d   : > { %881 = vsyncadd (!%p735_p3), %s588_s29, 4294967168  ;;  %s16_s17 = sadd.s32 1, %s904_s17   ;;  %s1096_s12 = smov %s888_s13 }
 0x18e   : > { %p13_p5 = scmp.ge.s32.totalorder %s16_s17, 4   ;;  %s1097_s13 = smov %s892_s14 }
 0x18f   : > { %s1098_s14 = smov %s988_s25  ;;  %s1099_s15 = smov %s900_s16 }
 0x190   : > { %s1100_s16 = smov %s1102_s20  ;;  %15 = sbr.rel (!%p13_p5) target bundleno = 4 (0x4), region = 70 }
 0x197   :  { %593 = vsyncpa [#allocation3], 1 }
 0x198   :  { %595 = vsyncpa [#allocation3 + $0x1], 1 }

</bundles_post_ra>
